<compile_context>
chip_gen: v7x
topology: tpu7x:2x2x1
jax: 0.10.0
libtpu: 0.0.40
codegen_flags: <defaults>
</compile_context>

<pallas_src>
import jax
import jax.numpy as jnp
from jax.experimental import pallas as pl
from jax.experimental.pallas import tpu as pltpu

EPS = 1e-5
N_BLOCKS = 3


def residual_block_kernel(x_ref, w0_ref, b0_ref, wb_ref, g_ref, beta_ref, o_ref):
    # x_ref:    (N, D)            f32   input (also the residual)
    # w0_ref:   (D, D)            bf16  leading Linear weight (pre-transposed)
    # b0_ref:   (1, D)            f32   leading Linear bias
    # wb_ref:   (N_BLOCKS, D, D)  bf16  BasicBlock Linear weights (pre-transposed)
    # g_ref:    (N_BLOCKS, 1, D)  f32   BN gammas
    # beta_ref: (N_BLOCKS, 1, D)  f32   BN betas
    # o_ref:    (N, D)            f32   output
    x = x_ref[...]
    inv_n = 1.0 / x.shape[0]

    # Leading plain Linear of the ResidualBlock (no BN / ReLU).
    h = (
        jnp.dot(x.astype(jnp.bfloat16), w0_ref[...], preferred_element_type=jnp.float32)
        + b0_ref[...]
    )

    # Three BasicBlocks, fully unrolled.
    for i in range(N_BLOCKS):
        # BasicBlock Linear (bf16 operands, f32 accumulation on the MXU).
        # NOTE: the Linear bias is omitted on purpose -- a per-feature constant added before
        # train-mode BatchNorm cancels exactly (mean absorbs it, variance is unchanged).
        z = jnp.dot(h.astype(jnp.bfloat16), wb_ref[i],
                    preferred_element_type=jnp.float32)

        # Train-mode BatchNorm1d (biased batch variance, eps=1e-5) folded to one FMA.
        mean = jnp.sum(z, axis=0, keepdims=True) * inv_n            # (1, D)
        msq = jnp.sum(z * z, axis=0, keepdims=True) * inv_n         # (1, D)
        var = jnp.maximum(msq - mean * mean, 0.0)                   # clamp cancellation
        scale = g_ref[i] * jax.lax.rsqrt(var + EPS)                 # (1, D)
        shift = beta_ref[i] - mean * scale                          # (1, D)
        h = jnp.maximum(z * scale + shift, 0.0)                     # BN + ReLU

    # Residual add (input_dim == output_dim, as required by the PyTorch module).
    o_ref[...] = h + x


def residual_block(x, w0_bf16, b0, wb_bf16, gamma, beta):
    """w0_bf16 / wb_bf16 must already be bf16 (cast once at parameter-init time)."""
    assert w0_bf16.dtype == jnp.bfloat16 and wb_bf16.dtype == jnp.bfloat16
    N, D = x.shape

    vmem = pl.BlockSpec(memory_space=pltpu.MemorySpace.VMEM)
    return pl.pallas_call(
        residual_block_kernel,
        out_shape=jax.ShapeDtypeStruct((N, D), jnp.float32),
        in_specs=[vmem] * 6,
        out_specs=vmem,
    )(x, w0_bf16, b0, wb_bf16, gamma, beta)


# ---------------------------------------------------------------------------
# References
# ---------------------------------------------------------------------------
def reference_pytorch_f32(x, w0, b0, wb, bb, gamma, beta):
    """Faithful f32 mirror of the PyTorch forward (train-mode BN, with Linear biases)."""
    h = x @ w0 + b0
    for i in range(N_BLOCKS):
        h = h @ wb[i] + bb[i]
        mean = jnp.mean(h, axis=0, keepdims=True)
        var = jnp.mean((h - mean) ** 2, axis=0, keepdims=True)
        h = (h - mean) / jnp.sqrt(var + EPS)
        h = h * gamma[i] + beta[i]
        h = jnp.maximum(h, 0.0)
    return h + x


def reference_kernel_algebra(x, w0, b0, wb, gamma, beta):
    """Same algebra as the kernel (bf16 dot operands, no bb, fused BN) for a tight check."""
    h = jnp.dot(x.astype(jnp.bfloat16), w0.astype(jnp.bfloat16),
                preferred_element_type=jnp.float32) + b0
    inv_n = 1.0 / x.shape[0]
    for i in range(N_BLOCKS):
        z = jnp.dot(h.astype(jnp.bfloat16), wb[i].astype(jnp.bfloat16),
                    preferred_element_type=jnp.float32)
        mean = jnp.sum(z, axis=0, keepdims=True) * inv_n
        msq = jnp.sum(z * z, axis=0, keepdims=True) * inv_n
        var = jnp.maximum(msq - mean * mean, 0.0)
        scale = gamma[i] * jax.lax.rsqrt(var + EPS)
        shift = beta[i] - mean * scale
        h = jnp.maximum(z * scale + shift, 0.0)
    return h + x


if __name__ == "__main__":
    # Small shapes: residual add forces input_dim == output_dim (= 256 default).
    N, D = 16, 256

    key = jax.random.PRNGKey(0)
    kx, k0w, k0b, kbw, kbb, kg, kbeta = jax.random.split(key, 7)

    x = jax.random.normal(kx, (N, D), dtype=jnp.float32)

    # Synthetic parameters with shapes matching the nn.Module __init__ (weights pre-transposed).
    w0 = jax.random.normal(k0w, (D, D), dtype=jnp.float32) * 0.05          # Linear(D,D).weight.T
    b0 = jax.random.normal(k0b, (1, D), dtype=jnp.float32) * 0.05          # Linear(D,D).bias
    wb = jax.random.normal(kbw, (N_BLOCKS, D, D), dtype=jnp.float32) * 0.05  # BasicBlock weights.T
    bb = jax.random.normal(kbb, (N_BLOCKS, 1, D), dtype=jnp.float32) * 0.05  # BasicBlock biases
    gamma = 1.0 + 0.1 * jax.random.normal(kg, (N_BLOCKS, 1, D), dtype=jnp.float32)   # BN weight
    beta = 0.1 * jax.random.normal(kbeta, (N_BLOCKS, 1, D), dtype=jnp.float32)       # BN bias

    # Cast MXU weights to bf16 ONCE, at "parameter-init" time (not per call).
    w0_bf16 = jax.block_until_ready(w0.astype(jnp.bfloat16))
    wb_bf16 = jax.block_until_ready(wb.astype(jnp.bfloat16))

    out = residual_block(x, w0_bf16, b0, wb_bf16, gamma, beta)
    out = jax.block_until_ready(out)
    assert out.shape == (N, D)

    # Tight check against a pure-JAX implementation of the exact same algebra.
    ref_tight = reference_kernel_algebra(x, w0, b0, wb, gamma, beta)
    assert jnp.allclose(out, ref_tight, atol=2e-3, rtol=2e-3), \
        float(jnp.max(jnp.abs(out - ref_tight)))

    # Looser check against the faithful f32 PyTorch semantics (includes the cancelled bias);
    # tolerance accounts for bf16 matmul operands.
    ref_f32 = reference_pytorch_f32(x, w0, b0, wb, bb, gamma, beta)
    assert jnp.allclose(out, ref_f32, atol=1e-1, rtol=1e-1), \
        float(jnp.max(jnp.abs(out - ref_f32)))

    print("KERNEL_OK")
</pallas_src>

<mosaic_0001>
module attributes {stable_mosaic.version = 11 : i64} {
  func.func @residual_block_kernel(%arg0: memref<16x256xf32, #tpu.memory_space<vmem>>, %arg1: memref<256x256xbf16, #tpu.memory_space<vmem>>, %arg2: memref<1x256xf32, #tpu.memory_space<vmem>>, %arg3: memref<3x256x256xbf16, #tpu.memory_space<vmem>>, %arg4: memref<3x1x256xf32, #tpu.memory_space<vmem>>, %arg5: memref<3x1x256xf32, #tpu.memory_space<vmem>>, %arg6: memref<16x256xf32, #tpu.memory_space<vmem>>) attributes {dimension_semantics = [], scalar_prefetch = 0 : i64, scratch_operands = 0 : i64, tpu.core_type = #tpu.core_type<tc>} {
    %c0 = arith.constant 0 : index
    %c0_0 = arith.constant 0 : index
    %0 = vector.load %arg0[%c0, %c0_0] : memref<16x256xf32, #tpu.memory_space<vmem>>, vector<16x256xf32>
    %1 = arith.truncf %0 : vector<16x256xf32> to vector<16x256xbf16>
    %c0_1 = arith.constant 0 : index
    %c0_2 = arith.constant 0 : index
    %2 = vector.load %arg1[%c0_1, %c0_2] : memref<256x256xbf16, #tpu.memory_space<vmem>>, vector<256x256xbf16>
    %cst = arith.constant dense<0.000000e+00> : vector<16x256xf32>
    %3 = tpu.matmul %1, %2, %cst {dimension_numbers = #tpu.dot_dimension_numbers<[1], [0], [0], [1], [0, 0, 1, 1], [], []>} : vector<16x256xbf16>, vector<256x256xbf16>, vector<16x256xf32> -> vector<16x256xf32>
    %c0_3 = arith.constant 0 : index
    %c0_4 = arith.constant 0 : index
    %4 = vector.load %arg2[%c0_3, %c0_4] : memref<1x256xf32, #tpu.memory_space<vmem>>, vector<1x256xf32>
    %5 = vector.broadcast %4 : vector<1x256xf32> to vector<16x256xf32>
    %6 = arith.addf %3, %5 : vector<16x256xf32>
    %7 = arith.truncf %6 : vector<16x256xf32> to vector<16x256xbf16>
    %c0_5 = arith.constant 0 : index
    %c0_6 = arith.constant 0 : index
    %c0_7 = arith.constant 0 : index
    %8 = vector.load %arg3[%c0_5, %c0_6, %c0_7] : memref<3x256x256xbf16, #tpu.memory_space<vmem>>, vector<1x256x256xbf16>
    %9 = vector.shape_cast %8 : vector<1x256x256xbf16> to vector<256x256xbf16>
    %cst_8 = arith.constant dense<0.000000e+00> : vector<16x256xf32>
    %10 = tpu.matmul %7, %9, %cst_8 {dimension_numbers = #tpu.dot_dimension_numbers<[1], [0], [0], [1], [0, 0, 1, 1], [], []>} : vector<16x256xbf16>, vector<256x256xbf16>, vector<16x256xf32> -> vector<16x256xf32>
    %cst_9 = arith.constant dense<0.000000e+00> : vector<256xf32>
    %11 = vector.multi_reduction <add>, %10, %cst_9 [0] : vector<16x256xf32> to vector<256xf32>
    %12 = vector.shape_cast %11 : vector<256xf32> to vector<1x256xf32>
    %cst_10 = arith.constant 6.250000e-02 : f32
    %13 = vector.broadcast %cst_10 : f32 to vector<1x256xf32>
    %14 = arith.mulf %12, %13 : vector<1x256xf32>
    %15 = arith.mulf %10, %10 : vector<16x256xf32>
    %cst_11 = arith.constant dense<0.000000e+00> : vector<256xf32>
    %16 = vector.multi_reduction <add>, %15, %cst_11 [0] : vector<16x256xf32> to vector<256xf32>
    %17 = vector.shape_cast %16 : vector<256xf32> to vector<1x256xf32>
    %cst_12 = arith.constant 6.250000e-02 : f32
    %18 = vector.broadcast %cst_12 : f32 to vector<1x256xf32>
    %19 = arith.mulf %17, %18 : vector<1x256xf32>
    %20 = arith.mulf %14, %14 : vector<1x256xf32>
    %21 = arith.subf %19, %20 : vector<1x256xf32>
    %cst_13 = arith.constant 0.000000e+00 : f32
    %22 = vector.broadcast %cst_13 : f32 to vector<1x256xf32>
    %23 = arith.maximumf %21, %22 : vector<1x256xf32>
    %c0_14 = arith.constant 0 : index
    %c0_15 = arith.constant 0 : index
    %c0_16 = arith.constant 0 : index
    %24 = vector.load %arg4[%c0_14, %c0_15, %c0_16] : memref<3x1x256xf32, #tpu.memory_space<vmem>>, vector<1x1x256xf32>
    %25 = vector.shape_cast %24 : vector<1x1x256xf32> to vector<1x256xf32>
    %cst_17 = arith.constant 9.99999974E-6 : f32
    %26 = vector.broadcast %cst_17 : f32 to vector<1x256xf32>
    %27 = arith.addf %23, %26 : vector<1x256xf32>
    %28 = math.rsqrt %27 : vector<1x256xf32>
    %29 = arith.mulf %25, %28 : vector<1x256xf32>
    %c0_18 = arith.constant 0 : index
    %c0_19 = arith.constant 0 : index
    %c0_20 = arith.constant 0 : index
    %30 = vector.load %arg5[%c0_18, %c0_19, %c0_20] : memref<3x1x256xf32, #tpu.memory_space<vmem>>, vector<1x1x256xf32>
    %31 = vector.shape_cast %30 : vector<1x1x256xf32> to vector<1x256xf32>
    %32 = arith.mulf %14, %29 : vector<1x256xf32>
    %33 = arith.subf %31, %32 : vector<1x256xf32>
    %34 = vector.broadcast %29 : vector<1x256xf32> to vector<16x256xf32>
    %35 = arith.mulf %10, %34 : vector<16x256xf32>
    %36 = vector.broadcast %33 : vector<1x256xf32> to vector<16x256xf32>
    %37 = arith.addf %35, %36 : vector<16x256xf32>
    %cst_21 = arith.constant 0.000000e+00 : f32
    %38 = vector.broadcast %cst_21 : f32 to vector<16x256xf32>
    %39 = arith.maximumf %37, %38 : vector<16x256xf32>
    %40 = arith.truncf %39 : vector<16x256xf32> to vector<16x256xbf16>
    %c1 = arith.constant 1 : index
    %c0_22 = arith.constant 0 : index
    %c0_23 = arith.constant 0 : index
    %41 = vector.load %arg3[%c1, %c0_22, %c0_23] : memref<3x256x256xbf16, #tpu.memory_space<vmem>>, vector<1x256x256xbf16>
    %42 = vector.shape_cast %41 : vector<1x256x256xbf16> to vector<256x256xbf16>
    %cst_24 = arith.constant dense<0.000000e+00> : vector<16x256xf32>
    %43 = tpu.matmul %40, %42, %cst_24 {dimension_numbers = #tpu.dot_dimension_numbers<[1], [0], [0], [1], [0, 0, 1, 1], [], []>} : vector<16x256xbf16>, vector<256x256xbf16>, vector<16x256xf32> -> vector<16x256xf32>
    %cst_25 = arith.constant dense<0.000000e+00> : vector<256xf32>
    %44 = vector.multi_reduction <add>, %43, %cst_25 [0] : vector<16x256xf32> to vector<256xf32>
    %45 = vector.shape_cast %44 : vector<256xf32> to vector<1x256xf32>
    %cst_26 = arith.constant 6.250000e-02 : f32
    %46 = vector.broadcast %cst_26 : f32 to vector<1x256xf32>
    %47 = arith.mulf %45, %46 : vector<1x256xf32>
    %48 = arith.mulf %43, %43 : vector<16x256xf32>
    %cst_27 = arith.constant dense<0.000000e+00> : vector<256xf32>
    %49 = vector.multi_reduction <add>, %48, %cst_27 [0] : vector<16x256xf32> to vector<256xf32>
    %50 = vector.shape_cast %49 : vector<256xf32> to vector<1x256xf32>
    %cst_28 = arith.constant 6.250000e-02 : f32
    %51 = vector.broadcast %cst_28 : f32 to vector<1x256xf32>
    %52 = arith.mulf %50, %51 : vector<1x256xf32>
    %53 = arith.mulf %47, %47 : vector<1x256xf32>
    %54 = arith.subf %52, %53 : vector<1x256xf32>
    %cst_29 = arith.constant 0.000000e+00 : f32
    %55 = vector.broadcast %cst_29 : f32 to vector<1x256xf32>
    %56 = arith.maximumf %54, %55 : vector<1x256xf32>
    %c1_30 = arith.constant 1 : index
    %c0_31 = arith.constant 0 : index
    %c0_32 = arith.constant 0 : index
    %57 = vector.load %arg4[%c1_30, %c0_31, %c0_32] : memref<3x1x256xf32, #tpu.memory_space<vmem>>, vector<1x1x256xf32>
    %58 = vector.shape_cast %57 : vector<1x1x256xf32> to vector<1x256xf32>
    %cst_33 = arith.constant 9.99999974E-6 : f32
    %59 = vector.broadcast %cst_33 : f32 to vector<1x256xf32>
    %60 = arith.addf %56, %59 : vector<1x256xf32>
    %61 = math.rsqrt %60 : vector<1x256xf32>
    %62 = arith.mulf %58, %61 : vector<1x256xf32>
    %c1_34 = arith.constant 1 : index
    %c0_35 = arith.constant 0 : index
    %c0_36 = arith.constant 0 : index
    %63 = vector.load %arg5[%c1_34, %c0_35, %c0_36] : memref<3x1x256xf32, #tpu.memory_space<vmem>>, vector<1x1x256xf32>
    %64 = vector.shape_cast %63 : vector<1x1x256xf32> to vector<1x256xf32>
    %65 = arith.mulf %47, %62 : vector<1x256xf32>
    %66 = arith.subf %64, %65 : vector<1x256xf32>
    %67 = vector.broadcast %62 : vector<1x256xf32> to vector<16x256xf32>
    %68 = arith.mulf %43, %67 : vector<16x256xf32>
    %69 = vector.broadcast %66 : vector<1x256xf32> to vector<16x256xf32>
    %70 = arith.addf %68, %69 : vector<16x256xf32>
    %cst_37 = arith.constant 0.000000e+00 : f32
    %71 = vector.broadcast %cst_37 : f32 to vector<16x256xf32>
    %72 = arith.maximumf %70, %71 : vector<16x256xf32>
    %73 = arith.truncf %72 : vector<16x256xf32> to vector<16x256xbf16>
    %c2 = arith.constant 2 : index
    %c0_38 = arith.constant 0 : index
    %c0_39 = arith.constant 0 : index
    %74 = vector.load %arg3[%c2, %c0_38, %c0_39] : memref<3x256x256xbf16, #tpu.memory_space<vmem>>, vector<1x256x256xbf16>
    %75 = vector.shape_cast %74 : vector<1x256x256xbf16> to vector<256x256xbf16>
    %cst_40 = arith.constant dense<0.000000e+00> : vector<16x256xf32>
    %76 = tpu.matmul %73, %75, %cst_40 {dimension_numbers = #tpu.dot_dimension_numbers<[1], [0], [0], [1], [0, 0, 1, 1], [], []>} : vector<16x256xbf16>, vector<256x256xbf16>, vector<16x256xf32> -> vector<16x256xf32>
    %cst_41 = arith.constant dense<0.000000e+00> : vector<256xf32>
    %77 = vector.multi_reduction <add>, %76, %cst_41 [0] : vector<16x256xf32> to vector<256xf32>
    %78 = vector.shape_cast %77 : vector<256xf32> to vector<1x256xf32>
    %cst_42 = arith.constant 6.250000e-02 : f32
    %79 = vector.broadcast %cst_42 : f32 to vector<1x256xf32>
    %80 = arith.mulf %78, %79 : vector<1x256xf32>
    %81 = arith.mulf %76, %76 : vector<16x256xf32>
    %cst_43 = arith.constant dense<0.000000e+00> : vector<256xf32>
    %82 = vector.multi_reduction <add>, %81, %cst_43 [0] : vector<16x256xf32> to vector<256xf32>
    %83 = vector.shape_cast %82 : vector<256xf32> to vector<1x256xf32>
    %cst_44 = arith.constant 6.250000e-02 : f32
    %84 = vector.broadcast %cst_44 : f32 to vector<1x256xf32>
    %85 = arith.mulf %83, %84 : vector<1x256xf32>
    %86 = arith.mulf %80, %80 : vector<1x256xf32>
    %87 = arith.subf %85, %86 : vector<1x256xf32>
    %cst_45 = arith.constant 0.000000e+00 : f32
    %88 = vector.broadcast %cst_45 : f32 to vector<1x256xf32>
    %89 = arith.maximumf %87, %88 : vector<1x256xf32>
    %c2_46 = arith.constant 2 : index
    %c0_47 = arith.constant 0 : index
    %c0_48 = arith.constant 0 : index
    %90 = vector.load %arg4[%c2_46, %c0_47, %c0_48] : memref<3x1x256xf32, #tpu.memory_space<vmem>>, vector<1x1x256xf32>
    %91 = vector.shape_cast %90 : vector<1x1x256xf32> to vector<1x256xf32>
    %cst_49 = arith.constant 9.99999974E-6 : f32
    %92 = vector.broadcast %cst_49 : f32 to vector<1x256xf32>
    %93 = arith.addf %89, %92 : vector<1x256xf32>
    %94 = math.rsqrt %93 : vector<1x256xf32>
    %95 = arith.mulf %91, %94 : vector<1x256xf32>
    %c2_50 = arith.constant 2 : index
    %c0_51 = arith.constant 0 : index
    %c0_52 = arith.constant 0 : index
    %96 = vector.load %arg5[%c2_50, %c0_51, %c0_52] : memref<3x1x256xf32, #tpu.memory_space<vmem>>, vector<1x1x256xf32>
    %97 = vector.shape_cast %96 : vector<1x1x256xf32> to vector<1x256xf32>
    %98 = arith.mulf %80, %95 : vector<1x256xf32>
    %99 = arith.subf %97, %98 : vector<1x256xf32>
    %100 = vector.broadcast %95 : vector<1x256xf32> to vector<16x256xf32>
    %101 = arith.mulf %76, %100 : vector<16x256xf32>
    %102 = vector.broadcast %99 : vector<1x256xf32> to vector<16x256xf32>
    %103 = arith.addf %101, %102 : vector<16x256xf32>
    %cst_53 = arith.constant 0.000000e+00 : f32
    %104 = vector.broadcast %cst_53 : f32 to vector<16x256xf32>
    %105 = arith.maximumf %103, %104 : vector<16x256xf32>
    %106 = arith.addf %105, %0 : vector<16x256xf32>
    %c0_54 = arith.constant 0 : index
    %c0_55 = arith.constant 0 : index
    %107 = vector.load %arg6[%c0_54, %c0_55] : memref<16x256xf32, #tpu.memory_space<vmem>>, vector<16x256xf32>
    tpu.vector_store %arg6[%c0_54, %c0_55], %106 {strides = array<i32>} : memref<16x256xf32, #tpu.memory_space<vmem>>, vector<16x256xf32>,
    return
  }
}

</mosaic_0001>

<bundles_post_ra>
// kernel: tpu_custom_call.1
= control target key start
LH: loop header
LB: loop body
LE: loop exit
PB: predicated region body
PF: predicated region fallthrough
CT: control target
= control target key end

     0   :  { %11 = vsyncpa [#allocation3], 0  ;;  %s2062_s0 = inlined_call_operand.hbm [shape: f32[16,256], index: 0, kind: input, shape index: {}]   ;;  %s2063_s1 = inlined_call_operand.hbm [shape: bf16[256,256], index: 1, kind: input, shape index: {}]   ;;  %s2064_s2 = inlined_call_operand.vmem [shape: f32[1,256], index: 2, kind: input, shape index: {}]   ;;  %s2065_s3 = inlined_call_operand.hbm [shape: bf16[3,256,256], index: 3, kind: input, shape index: {}]   ;;  %s2066_s4 = inlined_call_operand.vmem [shape: f32[3,1,256], index: 4, kind: input, shape index: {}]   ;;  %s2067_s5 = inlined_call_operand.vmem [shape: f32[3,1,256], index: 5, kind: input, shape index: {}]   ;;  %s2068_s6 = inlined_call_operand.hbm [shape: f32[16,256], index: 6, kind: output, shape index: {}]  }
   0x1   :  { %12 = vsyncpa [#allocation6], 0 }
   0x2   :  { %13 = vsyncpa [#allocation4], 0  ;;  %s1868_s21 = smov [#allocation5]   ;;  %s1774_s25 = scalar_lea.hbm %s2063_s1, 4096 }
   0x3   :  { %s31_s22 = sshll.u32 %s1868_s21, 4  ;;  %p1775_p0 = scmp.ne.s32.totalorder %s2063_s1, %s1774_s25  ;;  %s32_s22 = int_to_ptr.vmem [resolvable:$true] %s31_s22 }
   0x4   :  { %p1778_p1 = scmp.lt.u32.totalorder %s1774_s25, %s2063_s1 }
   0x6   :  { %p1780_p2 = pnand %p1778_p1, %p1775_p0 }
   0x8   :  { %1783 = shalt.err (!%p1780_p2)
}
   0x9   :  { %s1784_s30 = scalar_lea.vmem %s32_s22, 4096  ;;  %p1789_p4 = scmp.lt.s32.totalorder %s32_s22, %s32_s22 }
   0xa   :  { %p1785_p3 = scmp.ne.s32.totalorder %s32_s22, %s1784_s30  ;;  %p1790_p5 = scmp.lt.s32.totalorder %s1784_s30, %s1784_s30 }
   0xc   :  { %p1791_p6 = por %p1790_p5, %p1789_p4 }
   0xe   :  { %p1792_p7 = pnand %p1791_p6, %p1785_p3 }
  0x10   :  { %1795 = shalt.err (!%p1792_p7)
}
  0x11   :  { %s1869_s7 = smov 128   ;;  %s1870_s8 = smov 8  }
  0x12   :  { %37 = dma.hbm_to_vmem [thread:$0]  %s2063_s1, 4096, %s32_s22, [#allocation6], %s1869_s7, %s1869_s7, %s1870_s8  }
  0x13   :  { %s1871_s11 = smov [#allocation2]   ;;  %s1796_s15 = scalar_lea.hbm %s2062_s0, 512 }
  0x14   :  { %s19_s12 = sshll.u32 %s1871_s11, 4  ;;  %p1797_p8 = scmp.ne.s32.totalorder %s2062_s0, %s1796_s15  ;;  %s20_s12 = int_to_ptr.vmem [resolvable:$true] %s19_s12 }
  0x15   :  { %p1800_p9 = scmp.lt.u32.totalorder %s1796_s15, %s2062_s0 }
  0x17   :  { %p1802_p10 = pnand %p1800_p9, %p1797_p8 }
  0x19   :  { %1805 = shalt.err (!%p1802_p10)
}
  0x1a   :  { %s1806_s20 = scalar_lea.vmem %s20_s12, 512  ;;  %p1811_p12 = scmp.lt.s32.totalorder %s20_s12, %s20_s12 }
  0x1b   :  { %p1807_p11 = scmp.ne.s32.totalorder %s20_s12, %s1806_s20  ;;  %p1812_p13 = scmp.lt.s32.totalorder %s1806_s20, %s1806_s20 }
  0x1d   :  { %p1813_p0 = por %p1812_p13, %p1811_p12 }
  0x1f   :  { %p1814_p1 = pnand %p1813_p0, %p1807_p11 }
  0x21   :  { %1817 = shalt.err (!%p1814_p1)
}
  0x22   :  { %s1872_s1 = smov 256   ;;  %s1873_s21 = smov 16  }
  0x23   :  { %25 = dma.hbm_to_vmem [thread:$0]  %s2062_s0, 512, %s20_s12, [#allocation3], %s1872_s1, %s1872_s1, %s1873_s21  }
  0x24   :  { %s1874_s24 = smov [#allocation7]   ;;  %s1818_s28 = scalar_lea.hbm %s2065_s3, 12288 }
  0x25   :  { %s45_s25 = sshll.u32 %s1874_s24, 4  ;;  %p1819_p2 = scmp.ne.s32.totalorder %s2065_s3, %s1818_s28  ;;  %s46_s25 = int_to_ptr.vmem [resolvable:$true] %s45_s25 }
  0x26   :  { %p1822_p3 = scmp.lt.u32.totalorder %s1818_s28, %s2065_s3 }
  0x28   :  { %p1824_p4 = pnand %p1822_p3, %p1819_p2 }
  0x2a   :  { %1827 = shalt.err (!%p1824_p4)
}
  0x2b   :  { %s1828_s11 = scalar_lea.vmem %s46_s25, 12288  ;;  %p1833_p6 = scmp.lt.s32.totalorder %s46_s25, %s46_s25 }
  0x2c   :  { %p1829_p5 = scmp.ne.s32.totalorder %s46_s25, %s1828_s11  ;;  %p1834_p7 = scmp.lt.s32.totalorder %s1828_s11, %s1828_s11 }
  0x2e   :  { %p1835_p8 = por %p1834_p7, %p1833_p6 }
  0x30   :  { %p1836_p9 = pnand %p1835_p8, %p1829_p5 }
  0x32   :  { %1839 = shalt.err (!%p1836_p9)
}
  0x33   :  { %51 = dma.hbm_to_vmem [thread:$0]  %s2065_s3, 12288, %s46_s25, [#allocation6], %s1869_s7, %s1869_s7, %s1870_s8  }
  0x34   :  { %1862 = dma.done.wait [#allocation3], 512  }
  0x35   :  { %1863 = vsyncadd [#allocation3], 4294966784 }
  0x36   :  { %1864 = dma.done.wait [#allocation6], 16384  }
  0x37   :  { %1865 = vsyncadd [#allocation6], 4294950912  ;;  %v1568_v0 = vld [vmem:[#allocation5 + $0x4] ss:$8 sps:$4 sm:$0xff]   ;;  %v1570_v1 = vld [vmem:[#allocation5] ss:$8 sps:$4 sm:$0xff]  }
  0x38   :  { %275 = vmatprep.subr.bf16.mxu0 %v1568_v0  ;;  %v1571_v2 = vld [vmem:[#allocation5 + $0x14] ss:$8 sps:$4 sm:$0xff]   ;;  %v1573_v3 = vld [vmem:[#allocation5 + $0x10] ss:$8 sps:$4 sm:$0xff]   ;;  %v1574_v4 = vld [vmem:[#allocation5 + $0x24] ss:$8 sps:$4 sm:$0xff]  }
  0x39   :  { %276 = vmatpush1.bf16.msra.mxu0 %v1570_v1  ;;  %v1576_v5 = vld [vmem:[#allocation5 + $0x20] ss:$8 sps:$4 sm:$0xff]   ;;  %v1577_v6 = vld [vmem:[#allocation5 + $0x34] ss:$8 sps:$4 sm:$0xff]   ;;  %v1579_v7 = vld [vmem:[#allocation5 + $0x30] ss:$8 sps:$4 sm:$0xff]  }
  0x3a   :  { %277 = vmatprep.subr.bf16.mxu0 %v1571_v2  ;;  %v1580_v8 = vld [vmem:[#allocation5 + $0x44] ss:$8 sps:$4 sm:$0xff]   ;;  %v1582_v9 = vld [vmem:[#allocation5 + $0x40] ss:$8 sps:$4 sm:$0xff]   ;;  %v1583_v10 = vld [vmem:[#allocation5 + $0x54] ss:$8 sps:$4 sm:$0xff]  }
  0x3b   :  { %v1585_v11 = vld [vmem:[#allocation5 + $0x50] ss:$8 sps:$4 sm:$0xff]   ;;  %v1586_v12 = vld [vmem:[#allocation5 + $0x64] ss:$8 sps:$4 sm:$0xff]   ;;  %v1588_v15 = vld [vmem:[#allocation5 + $0x60] ss:$8 sps:$4 sm:$0xff]  }
  0x3c   :  { %v66_v13 = vld [vmem:[#allocation2 + $0x8] sm:$0xff]  ;;  %v68_v14 = vld [vmem:[#allocation2 + $0x18] sm:$0xff]  ;;  %v1957_v55 = vld [vmem:[#allocation2] sm:$0xff] }
  0x3d   :  { %278 = vmatpush1.bf16.msra.mxu0 %v1573_v3  ;;  %v1589_v16 = vld [vmem:[#allocation5 + $0x74] ss:$8 sps:$4 sm:$0xff]   ;;  %v70_v17 = vpack.c.bf16 %v68_v14, %v66_v13  ;;  %v1616_v18 = vld [vmem:[#allocation7 + $0x4] ss:$8 sps:$4 sm:$0xff]   ;;  %v1618_v19 = vld [vmem:[#allocation7] ss:$8 sps:$4 sm:$0xff]  }
  0x3e   :  { %279 = vmatprep.subr.bf16.mxu0 %v1574_v4  ;;  %v1619_v20 = vld [vmem:[#allocation7 + $0x14] ss:$8 sps:$4 sm:$0xff]   ;;  %512 = vmatprep.subr.bf16.mxu1 %v1616_v18  ;;  %v1621_v21 = vld [vmem:[#allocation7 + $0x10] ss:$8 sps:$4 sm:$0xff]   ;;  %v1622_v23 = vld [vmem:[#allocation7 + $0x24] ss:$8 sps:$4 sm:$0xff]  }
  0x3f   :  { %307 = vmatprep.mubr.bf16.mxu0 %v70_v17  ;;  %513 = vmatpush1.bf16.msra.mxu1 %v1618_v19  ;;  %v1591_v22 = vld [vmem:[#allocation5 + $0x70] ss:$8 sps:$4 sm:$0xff]   ;;  %v1592_v24 = vld [vmem:[#allocation5 + $0x84] ss:$8 sps:$4 sm:$0xff]   ;;  %v1624_v25 = vld [vmem:[#allocation7 + $0x20] ss:$8 sps:$4 sm:$0xff]  }
  0x40   :  { %514 = vmatprep.subr.bf16.mxu1 %v1619_v20  ;;  %v1594_v26 = vld [vmem:[#allocation5 + $0x80] ss:$8 sps:$4 sm:$0xff]   ;;  %v1625_v27 = vld [vmem:[#allocation7 + $0x34] ss:$8 sps:$4 sm:$0xff]   ;;  %v1627_v29 = vld [vmem:[#allocation7 + $0x30] ss:$8 sps:$4 sm:$0xff]  }
  0x41   :  { %280 = vmatpush1.bf16.msra.mxu0 %v1576_v5  ;;  %v1595_v28 = vld [vmem:[#allocation5 + $0x94] ss:$8 sps:$4 sm:$0xff]   ;;  %v1597_v30 = vld [vmem:[#allocation5 + $0x90] ss:$8 sps:$4 sm:$0xff]   ;;  %v1628_v31 = vld [vmem:[#allocation7 + $0x44] ss:$8 sps:$4 sm:$0xff]  }
  0x42   :  { %281 = vmatprep.subr.bf16.mxu0 %v1577_v6  ;;  %v1598_v32 = vld [vmem:[#allocation5 + $0xa4] ss:$8 sps:$4 sm:$0xff]   ;;  %v1630_v33 = vld [vmem:[#allocation7 + $0x40] ss:$8 sps:$4 sm:$0xff]   ;;  %v1631_v35 = vld [vmem:[#allocation7 + $0x54] ss:$8 sps:$4 sm:$0xff]   ;;  %v105_v6 = vlaneseq }
  0x43   :  { %515 = vmatpush1.bf16.msra.mxu1 %v1621_v21  ;;  %v1600_v34 = vld [vmem:[#allocation5 + $0xa0] ss:$8 sps:$4 sm:$0xff]   ;;  %v1601_v36 = vld [vmem:[#allocation5 + $0xb4] ss:$8 sps:$4 sm:$0xff]   ;;  %v1603_v37 = vld [vmem:[#allocation5 + $0xb0] ss:$8 sps:$4 sm:$0xff]  }
  0x44   :  { %516 = vmatprep.subr.bf16.mxu1 %v1622_v23  ;;  %v1633_v38 = vld [vmem:[#allocation7 + $0x50] ss:$8 sps:$4 sm:$0xff]   ;;  %v1634_v39 = vld [vmem:[#allocation7 + $0x64] ss:$8 sps:$4 sm:$0xff]   ;;  %v1636_v41 = vld [vmem:[#allocation7 + $0x60] ss:$8 sps:$4 sm:$0xff]  }
  0x45   :  { %282 = vmatpush1.bf16.msra.mxu0 %v1579_v7  ;;  %v1604_v40 = vld [vmem:[#allocation5 + $0xc4] ss:$8 sps:$4 sm:$0xff]   ;;  %v1606_v42 = vld [vmem:[#allocation5 + $0xc0] ss:$8 sps:$4 sm:$0xff]   ;;  %v1637_v43 = vld [vmem:[#allocation7 + $0x74] ss:$8 sps:$4 sm:$0xff]  }
  0x46   :  { %283 = vmatprep.subr.bf16.mxu0 %v1580_v8  ;;  %v1607_v44 = vld [vmem:[#allocation5 + $0xd4] ss:$8 sps:$4 sm:$0xff]   ;;  %v1639_v45 = vld [vmem:[#allocation7 + $0x70] ss:$8 sps:$4 sm:$0xff]   ;;  %v1640_v47 = vld [vmem:[#allocation7 + $0x84] ss:$8 sps:$4 sm:$0xff]  }
  0x47   :  { %517 = vmatpush1.bf16.msra.mxu1 %v1624_v25  ;;  %v1609_v46 = vld [vmem:[#allocation5 + $0xd0] ss:$8 sps:$4 sm:$0xff]   ;;  %v1610_v48 = vld [vmem:[#allocation5 + $0xe4] ss:$8 sps:$4 sm:$0xff]   ;;  %v1642_v49 = vld [vmem:[#allocation7 + $0x80] ss:$8 sps:$4 sm:$0xff]  }
  0x48   :  { %518 = vmatprep.subr.bf16.mxu1 %v1625_v27  ;;  %v1612_v50 = vld [vmem:[#allocation5 + $0xe0] ss:$8 sps:$4 sm:$0xff]   ;;  %v1643_v51 = vld [vmem:[#allocation7 + $0x94] ss:$8 sps:$4 sm:$0xff]   ;;  %v1645_v53 = vld [vmem:[#allocation7 + $0x90] ss:$8 sps:$4 sm:$0xff]  }
  0x49   :  { %284 = vmatpush1.bf16.msra.mxu0 %v1582_v9  ;;  %v1613_v52 = vld [vmem:[#allocation5 + $0xf4] ss:$8 sps:$4 sm:$0xff]   ;;  %v1615_v54 = vld [vmem:[#allocation5 + $0xf0] ss:$8 sps:$4 sm:$0xff]   ;;  %v1646_v57 = vld [vmem:[#allocation7 + $0xa4] ss:$8 sps:$4 sm:$0xff]  }
  0x4a   :  { %285 = vmatprep.subr.bf16.mxu0 %v1583_v10  ;;  %v1959_v56 = vld [vmem:[#allocation2 + $0x10] sm:$0xff]  ;;  %v1648_v58 = vld [vmem:[#allocation7 + $0xa0] ss:$8 sps:$4 sm:$0xff]   ;;  %v1652_v62 = vld [vmem:[#allocation7 + $0xc4] ss:$8 sps:$4 sm:$0xff]   ;;  %v1963_v7 = vshrl.u32 %v105_v6, 7 }
  0x4b   :  { %519 = vmatpush1.bf16.msra.mxu1 %v1627_v29  ;;  %v1649_v59 = vld [vmem:[#allocation7 + $0xb4] ss:$8 sps:$4 sm:$0xff]   ;;  %v69_v60 = vpack.c.bf16 %v1959_v56, %v1957_v55  ;;  %v1651_v61 = vld [vmem:[#allocation7 + $0xb0] ss:$8 sps:$4 sm:$0xff]   ;;  %v1654_v63 = vld [vmem:[#allocation7 + $0xc0] ss:$8 sps:$4 sm:$0xff]  }
  0x4c   :  { %520 = vmatprep.subr.bf16.mxu1 %v1628_v31  ;;  %v1655_v0 = vld [vmem:[#allocation7 + $0xd4] ss:$8 sps:$4 sm:$0xff]   ;;  %v1657_v1 = vld [vmem:[#allocation7 + $0xd0] ss:$8 sps:$4 sm:$0xff]   ;;  %v1658_v2 = vld [vmem:[#allocation7 + $0xe4] ss:$8 sps:$4 sm:$0xff]  }
  0x4d   :  { %286 = vmatpush1.bf16.msra.mxu0 %v1585_v11  ;;  %v1660_v3 = vld [vmem:[#allocation7 + $0xe0] ss:$8 sps:$4 sm:$0xff]   ;;  %v1661_v4 = vld [vmem:[#allocation7 + $0xf4] ss:$8 sps:$4 sm:$0xff]   ;;  %v1663_v5 = vld [vmem:[#allocation7 + $0xf0] ss:$8 sps:$4 sm:$0xff]  }
  0x4e   :  { %287 = vmatprep.subr.bf16.mxu0 %v1586_v12  ;;  %v1966_v8 = vsub.s32 0, %v1963_v7  ;;  %v103_v9 = vld [vmem:[%s2064_s2] sm:$0x3]  ;;  %v1972_v10 = vsub.s32 1, %v1963_v7  ;;  %v1666_v23 = vld [vmem:[#allocation7 + $0x104] ss:$8 sps:$4 sm:$0xff]  }
  0x4f   :  { %521 = vmatpush1.bf16.msra.mxu1 %v1630_v33  ;;  %v1669_v25 = vld [vmem:[#allocation7 + $0x114] ss:$8 sps:$4 sm:$0xff]   ;;  %v1672_v27 = vld [vmem:[#allocation7 + $0x124] ss:$8 sps:$4 sm:$0xff]  }
  0x50   :  { %522 = vmatprep.subr.bf16.mxu1 %v1631_v35  ;;  %v108_v11 = vrot.slane %v103_v9, %v1966_v8  ;;  %v112_v13 = vrot.slane %v103_v9, %v1972_v10  ;;  %v1675_v29 = vld [vmem:[#allocation7 + $0x134] ss:$8 sps:$4 sm:$0xff]   ;;  %v1678_v31 = vld [vmem:[#allocation7 + $0x144] ss:$8 sps:$4 sm:$0xff]  }
  0x51   :  { %288 = vmatpush1.bf16.msra.mxu0 %v1588_v15  ;;  %v1681_v33 = vld [vmem:[#allocation7 + $0x154] ss:$8 sps:$4 sm:$0xff]   ;;  %v1684_v35 = vld [vmem:[#allocation7 + $0x164] ss:$8 sps:$4 sm:$0xff]  }
  0x52   :  { %289 = vmatprep.subr.bf16.mxu0 %v1589_v16 }
  0x53   :  { %523 = vmatpush1.bf16.msra.mxu1 %v1633_v38  ;;  %v1685_v38 = vld [vmem:[#allocation7 + $0x170] ss:$8 sps:$4 sm:$0xff]  }
  0x54   :  { %524 = vmatprep.subr.bf16.mxu1 %v1634_v39  ;;  %v1690_v39 = vld [vmem:[#allocation7 + $0x184] ss:$8 sps:$4 sm:$0xff]  }
  0x55   :  { %290 = vmatpush1.bf16.msra.mxu0 %v1591_v22 }
  0x56   :  { %291 = vmatprep.subr.bf16.mxu0 %v1592_v24  ;;  %v1664_v24 = vld [vmem:[#allocation7 + $0x100] ss:$8 sps:$4 sm:$0xff]  }
  0x57   :  { %525 = vmatpush1.bf16.msra.mxu1 %v1636_v41  ;;  %v1693_v41 = vld [vmem:[#allocation7 + $0x194] ss:$8 sps:$4 sm:$0xff]  }
  0x58   :  { %526 = vmatprep.subr.bf16.mxu1 %v1637_v43  ;;  %v1696_v43 = vld [vmem:[#allocation7 + $0x1a4] ss:$8 sps:$4 sm:$0xff]  }
  0x59   :  { %292 = vmatpush1.bf16.msra.mxu0 %v1594_v26  ;;  %v1667_v26 = vld [vmem:[#allocation7 + $0x110] ss:$8 sps:$4 sm:$0xff]  }
  0x5a   :  { %293 = vmatprep.subr.bf16.mxu0 %v1595_v28  ;;  %v1670_v28 = vld [vmem:[#allocation7 + $0x120] ss:$8 sps:$4 sm:$0xff]  }
  0x5b   :  { %527 = vmatpush1.bf16.msra.mxu1 %v1639_v45  ;;  %v1699_v45 = vld [vmem:[#allocation7 + $0x1b4] ss:$8 sps:$4 sm:$0xff]  }
  0x5c   :  { %528 = vmatprep.subr.bf16.mxu1 %v1640_v47  ;;  %v1702_v47 = vld [vmem:[#allocation7 + $0x1c4] ss:$8 sps:$4 sm:$0xff]  }
  0x5d   :  { %294 = vmatpush1.bf16.msra.mxu0 %v1597_v30  ;;  %v1673_v30 = vld [vmem:[#allocation7 + $0x130] ss:$8 sps:$4 sm:$0xff]  }
  0x5e   :  { %295 = vmatprep.subr.bf16.mxu0 %v1598_v32  ;;  %v1676_v32 = vld [vmem:[#allocation7 + $0x140] ss:$8 sps:$4 sm:$0xff]  }
  0x5f   :  { %529 = vmatpush1.bf16.msra.mxu1 %v1642_v49  ;;  %v1705_v49 = vld [vmem:[#allocation7 + $0x1d4] ss:$8 sps:$4 sm:$0xff]  }
  0x60   :  { %530 = vmatprep.subr.bf16.mxu1 %v1643_v51  ;;  %v1708_v51 = vld [vmem:[#allocation7 + $0x1e4] ss:$8 sps:$4 sm:$0xff]  }
  0x61   :  { %296 = vmatpush1.bf16.msra.mxu0 %v1600_v34  ;;  %v1679_v34 = vld [vmem:[#allocation7 + $0x150] ss:$8 sps:$4 sm:$0xff]  }
  0x62   :  { %297 = vmatprep.subr.bf16.mxu0 %v1601_v36  ;;  %v1682_v36 = vld [vmem:[#allocation7 + $0x160] ss:$8 sps:$4 sm:$0xff]  }
  0x63   :  { %531 = vmatpush1.bf16.msra.mxu1 %v1645_v53  ;;  %v1709_v53 = vld [vmem:[#allocation7 + $0x1f0] ss:$8 sps:$4 sm:$0xff]  }
  0x64   :  { %532 = vmatprep.subr.bf16.mxu1 %v1646_v57 }
  0x65   :  { %298 = vmatpush1.bf16.msra.mxu0 %v1603_v37  ;;  %v1687_v37 = vld [vmem:[#allocation7 + $0x174] ss:$8 sps:$4 sm:$0xff]  }
  0x66   :  { %299 = vmatprep.subr.bf16.mxu0 %v1604_v40  ;;  %v1688_v40 = vld [vmem:[#allocation7 + $0x180] ss:$8 sps:$4 sm:$0xff]  }
  0x67   :  { %533 = vmatpush1.bf16.msra.mxu1 %v1648_v58 }
  0x68   :  { %534 = vmatprep.subr.bf16.mxu1 %v1649_v59 }
  0x69   :  { %300 = vmatpush1.bf16.msra.mxu0 %v1606_v42  ;;  %v1691_v42 = vld [vmem:[#allocation7 + $0x190] ss:$8 sps:$4 sm:$0xff]  }
  0x6a   :  { %301 = vmatprep.subr.bf16.mxu0 %v1607_v44  ;;  %v1694_v44 = vld [vmem:[#allocation7 + $0x1a0] ss:$8 sps:$4 sm:$0xff]  }
  0x6b   :  { %535 = vmatpush1.bf16.msra.mxu1 %v1651_v61 }
  0x6c   :  { %536 = vmatprep.subr.bf16.mxu1 %v1652_v62 }
  0x6d   :  { %302 = vmatpush1.bf16.msra.mxu0 %v1609_v46  ;;  %v1697_v46 = vld [vmem:[#allocation7 + $0x1b0] ss:$8 sps:$4 sm:$0xff]  }
  0x6e   :  { %303 = vmatprep.subr.bf16.mxu0 %v1610_v48  ;;  %v1700_v48 = vld [vmem:[#allocation7 + $0x1c0] ss:$8 sps:$4 sm:$0xff]  }
  0x6f   :  { %537 = vmatpush1.bf16.msra.mxu1 %v1654_v63 }
  0x70   :  { %538 = vmatprep.subr.bf16.mxu1 %v1655_v0 }
  0x71   :  { %304 = vmatpush1.bf16.msra.mxu0 %v1612_v50  ;;  %v1703_v50 = vld [vmem:[#allocation7 + $0x1d0] ss:$8 sps:$4 sm:$0xff]  }
  0x72   :  { %305 = vmatprep.subr.bf16.mxu0 %v1613_v52  ;;  %v1706_v52 = vld [vmem:[#allocation7 + $0x1e0] ss:$8 sps:$4 sm:$0xff]  }
  0x73   :  { %539 = vmatpush1.bf16.msra.mxu1 %v1657_v1 }
  0x74   :  { %540 = vmatprep.subr.bf16.mxu1 %v1658_v2 }
  0x75   :  { %306 = vmatpush1.bf16.msra.mxu0 %v1615_v54  ;;  %v1711_v54 = vld [vmem:[#allocation7 + $0x1f4] ss:$8 sps:$4 sm:$0xff]  }
  0x76   :  { %872 = vmatprep.subr.bf16.mxu0 %v1666_v23 }
  0x77   :  { %541 = vmatpush1.bf16.msra.mxu1 %v1660_v3 }
  0x78   :  { %308 = vmatmul.mubr.bf16.vlgmr.msra.gmra.mrb[0].mxu0 %v69_v60  ;;  %542 = vmatprep.subr.bf16.mxu1 %v1661_v4 }
  0x79   :  { %873 = vmatpush1.bf16.msra.mxu0 %v1664_v24 }
  0x7a   :  { %874 = vmatprep.subr.bf16.mxu0 %v1669_v25 }
  0x7b   :  { %543 = vmatpush1.bf16.msra.mxu1 %v1663_v5 }
  0x7d   :  { %875 = vmatpush1.bf16.msra.mxu0 %v1667_v26 }
  0x7e   :  { %876 = vmatprep.subr.bf16.mxu0 %v1672_v27 }
  0x81   :  { %877 = vmatpush1.bf16.msra.mxu0 %v1670_v28 }
  0x82   :  { %878 = vmatprep.subr.bf16.mxu0 %v1675_v29 }
  0x85   :  { %879 = vmatpush1.bf16.msra.mxu0 %v1673_v30 }
  0x86   :  { %880 = vmatprep.subr.bf16.mxu0 %v1678_v31 }
  0x89   :  { %881 = vmatpush1.bf16.msra.mxu0 %v1676_v32 }
  0x8a   :  { %882 = vmatprep.subr.bf16.mxu0 %v1681_v33 }
  0x8d   :  { %883 = vmatpush1.bf16.msra.mxu0 %v1679_v34 }
  0x8e   :  { %884 = vmatprep.subr.bf16.mxu0 %v1684_v35 }
  0x91   :  { %885 = vmatpush1.bf16.msra.mxu0 %v1682_v36 }
  0x92   :  { %886 = vmatprep.subr.bf16.mxu0 %v1687_v37 }
  0x95   :  { %887 = vmatpush1.bf16.msra.mxu0 %v1685_v38 }
  0x96   :  { %888 = vmatprep.subr.bf16.mxu0 %v1690_v39 }
  0x99   :  { %889 = vmatpush1.bf16.msra.mxu0 %v1688_v40 }
  0x9a   :  { %890 = vmatprep.subr.bf16.mxu0 %v1693_v41 }
  0x9d   :  { %891 = vmatpush1.bf16.msra.mxu0 %v1691_v42 }
  0x9e   :  { %892 = vmatprep.subr.bf16.mxu0 %v1696_v43 }
  0xa1   :  { %893 = vmatpush1.bf16.msra.mxu0 %v1694_v44  ;;  %v1875_v44 = vmov 1966171168  }
  0xa2   :  { %894 = vmatprep.subr.bf16.mxu0 %v1699_v45  ;;  %v606_v45 = vunpack.c.l.s4 %v1875_v44  ;;  %v1750_v44 = vld [vmem:[#allocation7 + $0x2c4] ss:$8 sps:$4 sm:$0xff]  }
  0xa5   :  { %895 = vmatpush1.bf16.msra.mxu0 %v1697_v46  ;;  %v607_v46 = vunpack.c.0.s8 %v606_v45  ;;  %v1748_v45 = vld [vmem:[#allocation7 + $0x2c0] ss:$8 sps:$4 sm:$0xff]  }
  0xa6   :  { %896 = vmatprep.subr.bf16.mxu0 %v1702_v47 }
  0xa9   :  { %897 = vmatpush1.bf16.msra.mxu0 %v1700_v48  ;;  %v1992_v48 = vsub.s32 %v607_v46, %v1963_v7  ;;  %v1753_v46 = vld [vmem:[#allocation7 + $0x2d4] ss:$8 sps:$4 sm:$0xff]  }
  0xaa   :  { %898 = vmatprep.subr.bf16.mxu0 %v1705_v49 }
  0xad   :  { %899 = vmatpush1.bf16.msra.mxu0 %v1703_v50 }
  0xae   :  { %900 = vmatprep.subr.bf16.mxu0 %v1708_v51 }
  0xb1   :  { %901 = vmatpush1.bf16.msra.mxu0 %v1706_v52  ;;  %v597_v52 = vld [vmem:[%s2066_s4] sm:$0x3] }
  0xb2   :  { %902 = vmatprep.subr.bf16.mxu0 %v1711_v54 }
  0xb5   :  { %903 = vmatpush1.bf16.msra.mxu0 %v1709_v53 }
 0x14b   :  { %v309_v12 = vpop.f32.mrb[0].mxu0 }
 0x14c   :  { %v311_v14 = vpop.f32.mrb[1].mxu0  ;;  %v310_v16 = vadd.f32 %v309_v12, %v108_v11 }
 0x14d   :  { %v313_v15 = vpop.f32.mrb[2].mxu0  ;;  %v312_v19 = vadd.f32 %v311_v14, %v112_v13 }
 0x14e   :  { %v314_v17 = vadd.f32 %v313_v15, %v108_v11  ;;  %v315_v18 = vpop.f32.mrb[3].mxu0 }
 0x14f   :  { %v316_v20 = vadd.f32 %v315_v18, %v112_v13 }
 0x150   :  { %v318_v21 = vpack.c.bf16 %v314_v17, %v310_v16 }
 0x151   :  { %v319_v22 = vpack.c.bf16 %v316_v20, %v312_v19 }
 0x153   :  { %544 = vmatprep.mubr.bf16.mxu1 %v319_v22 }
 0x154   :  { %545 = vmatmul.mubr.bf16.vlgmr.msra.gmra.mrb[0].mxu1 %v318_v21 }
 0x227   :  { %v1976_v57 = vpop.f32.mrb[0].mxu1 }
 0x228   :  { %v1978_v58 = vpop.f32.mrb[1].mxu1  ;;  %v571_v60 = vmul.f32 %v1976_v57, %v1976_v57 }
 0x229   :  { %v1980_v59 = vpop.f32.mrb[2].mxu1  ;;  %v572_v0 = vmul.f32 %v1978_v58, %v1978_v58 }
 0x22a   :  { %v555_v61 = vadd.f32 %v1980_v59, %v1976_v57  ;;  %v573_v62 = vmul.f32 %v1980_v59, %v1980_v59  ;;  %v552_v63 = vpop.f32.mrb[3].mxu1 }
 0x22b   :  { %v562_v1 = vadd.f32 %v552_v63, %v1978_v58  ;;  %v574_v2 = vmul.f32 %v552_v63, %v552_v63 }
 0x22c   :  { %v556_v3 = vrot.slane %v555_v61, 4  ;;  %v575_v4 = vadd.f32 %v573_v62, %v571_v60 }
 0x22d   :  { %v563_v5 = vrot.slane %v562_v1, 4  ;;  %v582_v6 = vadd.f32 %v574_v2, %v572_v0 }
 0x22e   :  { %v557_v9 = vadd.f32 %v556_v3, %v555_v61  ;;  %v576_v11 = vrot.slane %v575_v4, 4 }
 0x22f   :  { %v564_v12 = vadd.f32 %v563_v5, %v562_v1  ;;  %v583_v13 = vrot.slane %v582_v6, 4 }
 0x230   :  { %v558_v14 = vrot.slane %v557_v9, 2  ;;  %v577_v15 = vadd.f32 %v576_v11, %v575_v4 }
 0x231   :  { %v565_v16 = vrot.slane %v564_v12, 2  ;;  %v584_v17 = vadd.f32 %v583_v13, %v582_v6  ;;  %v621_v6 = vld [vmem:[%s2067_s5] sm:$0x3] }
 0x232   :  { %v559_v18 = vadd.f32 %v558_v14, %v557_v9  ;;  %v578_v19 = vrot.slane %v577_v15, 2 }
 0x233   :  { %v566_v20 = vadd.f32 %v565_v16, %v564_v12  ;;  %v585_v21 = vrot.slane %v584_v17, 2 }
 0x234   :  { %v560_v22 = vrot.slane %v559_v18, 1  ;;  %v579_v23 = vadd.f32 %v578_v19, %v577_v15 }
 0x235   :  { %v567_v24 = vrot.slane %v566_v20, 1  ;;  %v586_v25 = vadd.f32 %v585_v21, %v584_v17  ;;  %v1712_v21 = vld [vmem:[#allocation7 + $0x200] ss:$8 sps:$4 sm:$0xff]  }
 0x236   :  { %v561_v26 = vadd.f32 %v560_v22, %v559_v18  ;;  %v580_v27 = vrot.slane %v579_v23, 1  ;;  %v1717_v22 = vld [vmem:[#allocation7 + $0x214] ss:$8 sps:$4 sm:$0xff]  }
 0x237   :  { %v568_v28 = vadd.f32 %v567_v24, %v566_v20  ;;  %v587_v29 = vrot.slane %v586_v25, 1  ;;  %v1714_v20 = vld [vmem:[#allocation7 + $0x204] ss:$8 sps:$4 sm:$0xff]  }
 0x238   :  { %v569_v30 = vmul.f32 0.0625, %v561_v26  ;;  %v581_v31 = vadd.f32 %v580_v27, %v579_v23  ;;  %1234 = vmatprep.subr.bf16.mxu1 %v1714_v20  ;;  %v1715_v23 = vld [vmem:[#allocation7 + $0x210] ss:$8 sps:$4 sm:$0xff]   ;;  %v1720_v24 = vld [vmem:[#allocation7 + $0x224] ss:$8 sps:$4 sm:$0xff]  }
 0x239   :  { %v570_v32 = vmul.f32 0.0625, %v568_v28  ;;  %v588_v33 = vadd.f32 %v587_v29, %v586_v25  ;;  %1235 = vmatpush1.bf16.msra.mxu1 %v1712_v21  ;;  %v1718_v25 = vld [vmem:[#allocation7 + $0x220] ss:$8 sps:$4 sm:$0xff]   ;;  %v1723_v26 = vld [vmem:[#allocation7 + $0x234] ss:$8 sps:$4 sm:$0xff]  }
 0x23a   :  { %v589_v34 = vmul.f32 0.0625, %v581_v31  ;;  %v591_v35 = vmul.f32 %v569_v30, %v569_v30  ;;  %1236 = vmatprep.subr.bf16.mxu1 %v1717_v22  ;;  %v1721_v27 = vld [vmem:[#allocation7 + $0x230] ss:$8 sps:$4 sm:$0xff]   ;;  %v1726_v28 = vld [vmem:[#allocation7 + $0x244] ss:$8 sps:$4 sm:$0xff]  }
 0x23b   :  { %v590_v36 = vmul.f32 0.0625, %v588_v33  ;;  %v592_v37 = vmul.f32 %v570_v32, %v570_v32  ;;  %v1724_v29 = vld [vmem:[#allocation7 + $0x240] ss:$8 sps:$4 sm:$0xff]   ;;  %v1727_v31 = vld [vmem:[#allocation7 + $0x250] ss:$8 sps:$4 sm:$0xff]  }
 0x23c   :  { %v593_v38 = vsub.f32 %v589_v34, %v591_v35  ;;  %v1730_v33 = vld [vmem:[#allocation7 + $0x260] ss:$8 sps:$4 sm:$0xff]   ;;  %v1735_v34 = vld [vmem:[#allocation7 + $0x274] ss:$8 sps:$4 sm:$0xff]   ;;  %v1733_v35 = vld [vmem:[#allocation7 + $0x270] ss:$8 sps:$4 sm:$0xff]  }
 0x23d   :  { %v594_v39 = vsub.f32 %v590_v36, %v592_v37  ;;  %1237 = vmatpush1.bf16.msra.mxu1 %v1715_v23  ;;  %v1738_v36 = vld [vmem:[#allocation7 + $0x284] ss:$8 sps:$4 sm:$0xff]   ;;  %v1736_v37 = vld [vmem:[#allocation7 + $0x280] ss:$8 sps:$4 sm:$0xff]  }
 0x23e   :  { %v595_v40 = vmax.f32 %v593_v38, 0.0  ;;  %1238 = vmatprep.subr.bf16.mxu1 %v1720_v24  ;;  %v1741_v38 = vld [vmem:[#allocation7 + $0x294] ss:$8 sps:$4 sm:$0xff]  }
 0x23f   :  { %v596_v41 = vmax.f32 %v594_v39, 0.0  ;;  %v1739_v39 = vld [vmem:[#allocation7 + $0x290] ss:$8 sps:$4 sm:$0xff]  }
 0x240   :  { %v598_v42 = vadd.f32 1e-05, %v595_v40  ;;  %v1744_v40 = vld [vmem:[#allocation7 + $0x2a4] ss:$8 sps:$4 sm:$0xff]  }
 0x241   :  { %v599_v43 = vadd.f32 1e-05, %v596_v41  ;;  %1239 = vmatpush1.bf16.msra.mxu1 %v1718_v25  ;;  %v1742_v41 = vld [vmem:[#allocation7 + $0x2a0] ss:$8 sps:$4 sm:$0xff]  }
 0x242   :  { %1760 = vrsqrt.f32 %v598_v42  ;;  %1240 = vmatprep.subr.bf16.mxu1 %v1723_v26  ;;  %v1747_v42 = vld [vmem:[#allocation7 + $0x2b4] ss:$8 sps:$4 sm:$0xff]  }
 0x243   :  { %1762 = vrsqrt.f32 %v599_v43  ;;  %v1745_v43 = vld [vmem:[#allocation7 + $0x2b0] ss:$8 sps:$4 sm:$0xff]  }
 0x245   :  { %1241 = vmatpush1.bf16.msra.mxu1 %v1721_v27 }
 0x246   :  { %1242 = vmatprep.subr.bf16.mxu1 %v1726_v28 }
 0x249   :  { %1243 = vmatpush1.bf16.msra.mxu1 %v1724_v29 }
 0x24c   :  { %v1761_v47 = vpop.eup %1760 }
 0x24d   :  { %v1763_v49 = vpop.eup %1762 }
 0x24e   :  { %v604_v50 = vcombine.low %v1761_v47, %v1763_v49  ;;  %v1751_v47 = vld [vmem:[#allocation7 + $0x2d0] ss:$8 sps:$4 sm:$0xff]   ;;  %v1756_v49 = vld [vmem:[#allocation7 + $0x2e4] ss:$8 sps:$4 sm:$0xff]  }
 0x250   :  { %v611_v51 = vrot.slane %v604_v50, %v1992_v48  ;;  %v1754_v50 = vld [vmem:[#allocation7 + $0x2e0] ss:$8 sps:$4 sm:$0xff]  }
 0x252   :  { %v618_v53 = vrot.slane %v611_v51, %v1992_v48  ;;  %v1757_v51 = vld [vmem:[#allocation7 + $0x2f0] ss:$8 sps:$4 sm:$0xff]  }
 0x254   :  { %v620_v54 = vmul.f32 %v618_v53, %v597_v52  ;;  %v1759_v52 = vld [vmem:[#allocation7 + $0x2f4] ss:$8 sps:$4 sm:$0xff]  }
 0x256   :  { %v626_v60 = vrot.slane %v620_v54, %v1966_v8  ;;  %v630_v61 = vrot.slane %v620_v54, %v1972_v10 }
 0x258   :  { %v633_v62 = vmul.f32 %v626_v60, %v569_v30  ;;  %v634_v0 = vmul.f32 %v630_v61, %v570_v32  ;;  %v657_v1 = vmul.f32 %v630_v61, %v552_v63  ;;  %v655_v7 = vmul.f32 %v630_v61, %v1978_v58  ;;  %v1729_v30 = vld [vmem:[#allocation7 + $0x254] ss:$8 sps:$4 sm:$0xff]   ;;  %v1732_v32 = vld [vmem:[#allocation7 + $0x264] ss:$8 sps:$4 sm:$0xff]  }
 0x259   :  { %v654_v2 = vmul.f32 %v626_v60, %v1976_v57  ;;  %v656_v3 = vmul.f32 %v626_v60, %v1980_v59  ;;  %1244 = vmatprep.subr.bf16.mxu1 %v1729_v30 }
 0x25a   :  { %v637_v4 = vcombine.low %v633_v62, %v634_v0  ;;  %1245 = vmatpush1.bf16.msra.mxu1 %v1727_v31 }
 0x25b   :  { %1246 = vmatprep.subr.bf16.mxu1 %v1732_v32 }
 0x25c   :  { %v644_v5 = vrot.slane %v637_v4, %v1992_v48 }
 0x25e   :  { %v651_v9 = vrot.slane %v644_v5, %v1992_v48  ;;  %1247 = vmatpush1.bf16.msra.mxu1 %v1730_v33 }
 0x25f   :  { %1248 = vmatprep.subr.bf16.mxu1 %v1735_v34 }
 0x260   :  { %v653_v11 = vsub.f32 %v621_v6, %v651_v9 }
 0x262   :  { %v662_v12 = vrot.slane %v653_v11, %v1966_v8  ;;  %v666_v63 = vrot.slane %v653_v11, %v1972_v10  ;;  %1249 = vmatpush1.bf16.msra.mxu1 %v1733_v35 }
 0x263   :  { %1250 = vmatprep.subr.bf16.mxu1 %v1738_v36 }
 0x264   :  { %v672_v13 = vadd.f32 %v666_v63, %v657_v1  ;;  %v670_v58 = vadd.f32 %v666_v63, %v655_v7  ;;  %v669_v14 = vadd.f32 %v662_v12, %v654_v2  ;;  %v671_v57 = vadd.f32 %v662_v12, %v656_v3 }
 0x266   :  { %v674_v15 = vmax.f32 %v670_v58, 0.0  ;;  %v676_v59 = vmax.f32 %v672_v13, 0.0  ;;  %v673_v16 = vmax.f32 %v669_v14, 0.0  ;;  %v675_v17 = vmax.f32 %v671_v57, 0.0  ;;  %1251 = vmatpush1.bf16.msra.mxu1 %v1736_v37 }
 0x267   :  { %1252 = vmatprep.subr.bf16.mxu1 %v1741_v38 }
 0x268   :  { %v678_v18 = vpack.c.bf16 %v676_v59, %v674_v15  ;;  %v677_v19 = vpack.c.bf16 %v675_v17, %v673_v16 }
 0x26a   :  { %904 = vmatprep.mubr.bf16.mxu0 %v678_v18  ;;  %1253 = vmatpush1.bf16.msra.mxu1 %v1739_v39 }
 0x26b   :  { %905 = vmatmul.mubr.bf16.vlgmr.msra.gmra.mrb[4].mxu0 %v677_v19  ;;  %1254 = vmatprep.subr.bf16.mxu1 %v1744_v40 }
 0x26e   :  { %1255 = vmatpush1.bf16.msra.mxu1 %v1742_v41 }
 0x26f   :  { %1256 = vmatprep.subr.bf16.mxu1 %v1747_v42 }
 0x272   :  { %1257 = vmatpush1.bf16.msra.mxu1 %v1745_v43 }
 0x273   :  { %1258 = vmatprep.subr.bf16.mxu1 %v1750_v44 }
 0x276   :  { %1259 = vmatpush1.bf16.msra.mxu1 %v1748_v45  ;;  %v1523_v45 = vld [vmem:[%s2066_s4 + $0x2] sm:$0x3] }
 0x277   :  { %1260 = vmatprep.subr.bf16.mxu1 %v1753_v46 }
 0x27a   :  { %1261 = vmatpush1.bf16.msra.mxu1 %v1751_v47 }
 0x27b   :  { %1262 = vmatprep.subr.bf16.mxu1 %v1756_v49 }
 0x27e   :  { %1263 = vmatpush1.bf16.msra.mxu1 %v1754_v50 }
 0x27f   :  { %1264 = vmatprep.subr.bf16.mxu1 %v1759_v52 }
 0x282   :  { %1265 = vmatpush1.bf16.msra.mxu1 %v1757_v51 }
 0x33e   :  { %v2011_v53 = vpop.f32.mrb[4].mxu0 }
 0x33f   :  { %v908_v54 = vpop.f32.mrb[5].mxu0  ;;  %v931_v61 = vmul.f32 %v2011_v53, %v2011_v53 }
 0x340   :  { %v910_v60 = vpop.f32.mrb[6].mxu0  ;;  %v932_v7 = vmul.f32 %v908_v54, %v908_v54 }
 0x341   :  { %v915_v62 = vadd.f32 %v910_v60, %v2011_v53  ;;  %v933_v0 = vmul.f32 %v910_v60, %v910_v60  ;;  %v912_v1 = vpop.f32.mrb[7].mxu0 }
 0x342   :  { %v922_v2 = vadd.f32 %v912_v1, %v908_v54  ;;  %v934_v3 = vmul.f32 %v912_v1, %v912_v1 }
 0x343   :  { %v916_v4 = vrot.slane %v915_v62, 4  ;;  %v935_v5 = vadd.f32 %v933_v0, %v931_v61 }
 0x344   :  { %v923_v6 = vrot.slane %v922_v2, 4  ;;  %v942_v9 = vadd.f32 %v934_v3, %v932_v7 }
 0x345   :  { %v917_v11 = vadd.f32 %v916_v4, %v915_v62  ;;  %v936_v12 = vrot.slane %v935_v5, 4  ;;  %v1524_v4 = vld [vmem:[%s2067_s5 + $0x2] sm:$0x3] }
 0x346   :  { %v924_v63 = vadd.f32 %v923_v6, %v922_v2  ;;  %v943_v13 = vrot.slane %v942_v9, 4 }
 0x347   :  { %v918_v58 = vrot.slane %v917_v11, 2  ;;  %v937_v14 = vadd.f32 %v936_v12, %v935_v5 }
 0x348   :  { %v925_v57 = vrot.slane %v924_v63, 2  ;;  %v944_v15 = vadd.f32 %v943_v13, %v942_v9 }
 0x349   :  { %v919_v59 = vadd.f32 %v918_v58, %v917_v11  ;;  %v938_v16 = vrot.slane %v937_v14, 2 }
 0x34a   :  { %v926_v17 = vadd.f32 %v925_v57, %v924_v63  ;;  %v945_v18 = vrot.slane %v944_v15, 2 }
 0x34b   :  { %v920_v19 = vrot.slane %v919_v59, 1  ;;  %v939_v20 = vadd.f32 %v938_v16, %v937_v14 }
 0x34c   :  { %v927_v21 = vrot.slane %v926_v17, 1  ;;  %v946_v22 = vadd.f32 %v945_v18, %v944_v15 }
 0x34d   :  { %v921_v23 = vadd.f32 %v920_v19, %v919_v59  ;;  %v940_v24 = vrot.slane %v939_v20, 1 }
 0x34e   :  { %v928_v25 = vadd.f32 %v927_v21, %v926_v17  ;;  %v947_v26 = vrot.slane %v946_v22, 1 }
 0x34f   :  { %v929_v27 = vmul.f32 0.0625, %v921_v23  ;;  %v941_v28 = vadd.f32 %v940_v24, %v939_v20 }
 0x350   :  { %v930_v29 = vmul.f32 0.0625, %v928_v25  ;;  %v948_v30 = vadd.f32 %v947_v26, %v946_v22 }
 0x351   :  { %v949_v31 = vmul.f32 0.0625, %v941_v28  ;;  %v951_v32 = vmul.f32 %v929_v27, %v929_v27 }
 0x352   :  { %v950_v33 = vmul.f32 0.0625, %v948_v30  ;;  %v952_v34 = vmul.f32 %v930_v29, %v930_v29 }
 0x353   :  { %v953_v35 = vsub.f32 %v949_v31, %v951_v32 }
 0x354   :  { %v954_v36 = vsub.f32 %v950_v33, %v952_v34 }
 0x355   :  { %v955_v37 = vmax.f32 %v953_v35, 0.0 }
 0x356   :  { %v956_v38 = vmax.f32 %v954_v36, 0.0 }
 0x357   :  { %v959_v39 = vadd.f32 1e-05, %v955_v37 }
 0x358   :  { %v960_v40 = vadd.f32 1e-05, %v956_v38 }
 0x359   :  { %1764 = vrsqrt.f32 %v959_v39 }
 0x35a   :  { %1766 = vrsqrt.f32 %v960_v40 }
 0x363   :  { %v1765_v41 = vpop.eup %1764 }
 0x364   :  { %v1767_v42 = vpop.eup %1766 }
 0x365   :  { %v965_v43 = vcombine.low %v1765_v41, %v1767_v42 }
 0x367   :  { %v972_v44 = vrot.slane %v965_v43, %v1992_v48 }
 0x369   :  { %v979_v46 = vrot.slane %v972_v44, %v1992_v48 }
 0x36b   :  { %v981_v47 = vmul.f32 %v1523_v45, %v979_v46 }
 0x36d   :  { %v988_v49 = vrot.slane %v981_v47, %v1966_v8  ;;  %v992_v50 = vrot.slane %v981_v47, %v1972_v10 }
 0x36f   :  { %v995_v51 = vmul.f32 %v988_v49, %v929_v27  ;;  %v996_v52 = vmul.f32 %v992_v50, %v930_v29  ;;  %v1019_v61 = vmul.f32 %v992_v50, %v912_v1  ;;  %v1017_v62 = vmul.f32 %v992_v50, %v908_v54 }
 0x370   :  { %v1016_v0 = vmul.f32 %v988_v49, %v2011_v53  ;;  %v1018_v7 = vmul.f32 %v988_v49, %v910_v60 }
 0x371   :  { %v999_v2 = vcombine.low %v995_v51, %v996_v52 }
 0x373   :  { %v1006_v3 = vrot.slane %v999_v2, %v1992_v48 }
 0x375   :  { %v1013_v5 = vrot.slane %v1006_v3, %v1992_v48 }
 0x377   :  { %v1015_v6 = vsub.f32 %v1524_v4, %v1013_v5 }
 0x379   :  { %v1024_v9 = vrot.slane %v1015_v6, %v1966_v8  ;;  %v1028_v11 = vrot.slane %v1015_v6, %v1972_v10 }
 0x37b   :  { %v1034_v12 = vadd.f32 %v1028_v11, %v1019_v61  ;;  %v1032_v1 = vadd.f32 %v1028_v11, %v1017_v62  ;;  %v1031_v54 = vadd.f32 %v1024_v9, %v1016_v0  ;;  %v1033_v63 = vadd.f32 %v1024_v9, %v1018_v7 }
 0x37d   :  { %v1038_v53 = vmax.f32 %v1034_v12, 0.0  ;;  %v1036_v60 = vmax.f32 %v1032_v1, 0.0  ;;  %v1035_v13 = vmax.f32 %v1031_v54, 0.0  ;;  %v1037_v58 = vmax.f32 %v1033_v63, 0.0  ;;  %v1557_v63 = vld [vmem:[%s2066_s4 + $0x4] sm:$0x3] }
 0x37e   :  { %s1876_s4 = smov [#allocation8]  }
 0x37f   :  { %v1040_v14 = vpack.c.bf16 %v1038_v53, %v1036_v60  ;;  %v1039_v57 = vpack.c.bf16 %v1037_v58, %v1035_v13  ;;  %s1414_s24 = sshll.u32 %s1876_s4, 4  ;;  %s1415_s24 = int_to_ptr.vmem [resolvable:$true] %s1414_s24 }
 0x380   :  { %p1845_p11 = scmp.lt.s32.totalorder %s1415_s24, %s1415_s24 }
 0x381   :  { %1266 = vmatprep.mubr.bf16.mxu1 %v1040_v14 }
 0x382   :  { %1267 = vmatmul.mubr.bf16.vlgmr.msra.gmra.mrb[4].mxu1 %v1039_v57 }
 0x455   :  { %v1268_v15 = vpop.f32.mrb[4].mxu1 }
 0x456   :  { %v1270_v59 = vpop.f32.mrb[5].mxu1  ;;  %v1293_v17 = vmul.f32 %v1268_v15, %v1268_v15 }
 0x457   :  { %v1272_v16 = vpop.f32.mrb[6].mxu1  ;;  %v1294_v21 = vmul.f32 %v1270_v59, %v1270_v59 }
 0x458   :  { %v1277_v18 = vadd.f32 %v1272_v16, %v1268_v15  ;;  %v1295_v19 = vmul.f32 %v1272_v16, %v1272_v16  ;;  %v1274_v20 = vpop.f32.mrb[7].mxu1 }
 0x459   :  { %v1284_v22 = vadd.f32 %v1274_v20, %v1270_v59  ;;  %v1296_v23 = vmul.f32 %v1274_v20, %v1274_v20 }
 0x45a   :  { %v1278_v24 = vrot.slane %v1277_v18, 4  ;;  %v1297_v25 = vadd.f32 %v1295_v19, %v1293_v17 }
 0x45b   :  { %v1285_v26 = vrot.slane %v1284_v22, 4  ;;  %v1304_v27 = vadd.f32 %v1296_v23, %v1294_v21 }
 0x45c   :  { %v1279_v28 = vadd.f32 %v1278_v24, %v1277_v18  ;;  %v1298_v29 = vrot.slane %v1297_v25, 4  ;;  %v1558_v24 = vld [vmem:[%s2067_s5 + $0x4] sm:$0x3]  ;;  %s1840_s5 = scalar_lea.vmem %s1415_s24, 512 }
 0x45d   :  { %v1286_v30 = vadd.f32 %v1285_v26, %v1284_v22  ;;  %v1305_v31 = vrot.slane %v1304_v27, 4  ;;  %p1841_p10 = scmp.ne.s32.totalorder %s1415_s24, %s1840_s5  ;;  %p1846_p12 = scmp.lt.s32.totalorder %s1840_s5, %s1840_s5 }
 0x45e   :  { %v1280_v32 = vrot.slane %v1279_v28, 2  ;;  %v1299_v33 = vadd.f32 %v1298_v29, %v1297_v25 }
 0x45f   :  { %v1287_v34 = vrot.slane %v1286_v30, 2  ;;  %v1306_v35 = vadd.f32 %v1305_v31, %v1304_v27  ;;  %p1847_p13 = por %p1846_p12, %p1845_p11 }
 0x460   :  { %v1281_v36 = vadd.f32 %v1280_v32, %v1279_v28  ;;  %v1300_v37 = vrot.slane %v1299_v33, 2 }
 0x461   :  { %v1288_v38 = vadd.f32 %v1287_v34, %v1286_v30  ;;  %v1307_v39 = vrot.slane %v1306_v35, 2  ;;  %p1848_p0 = pnand %p1847_p13, %p1841_p10 }
 0x462   :  { %v1282_v40 = vrot.slane %v1281_v36, 1  ;;  %v1301_v41 = vadd.f32 %v1300_v37, %v1299_v33  ;;  %v1772_v33 = vld [vmem:[#allocation2 + $0x8] sm:$0xff] }
 0x463   :  { %v1289_v42 = vrot.slane %v1288_v38, 1  ;;  %v1308_v43 = vadd.f32 %v1307_v39, %v1306_v35  ;;  %v1773_v35 = vld [vmem:[#allocation2 + $0x18] sm:$0xff] }
 0x464   :  { %v1283_v44 = vadd.f32 %v1282_v40, %v1281_v36  ;;  %v1302_v45 = vrot.slane %v1301_v41, 1 }
 0x465   :  { %v1290_v46 = vadd.f32 %v1289_v42, %v1288_v38  ;;  %v1309_v47 = vrot.slane %v1308_v43, 1 }
 0x466   :  { %v1291_v49 = vmul.f32 0.0625, %v1283_v44  ;;  %v1303_v50 = vadd.f32 %v1302_v45, %v1301_v41 }
 0x467   :  { %v1292_v51 = vmul.f32 0.0625, %v1290_v46  ;;  %v1310_v52 = vadd.f32 %v1309_v47, %v1308_v43 }
 0x468   :  { %v1311_v61 = vmul.f32 0.0625, %v1303_v50  ;;  %v1313_v62 = vmul.f32 %v1291_v49, %v1291_v49 }
 0x469   :  { %v1312_v0 = vmul.f32 0.0625, %v1310_v52  ;;  %v1314_v7 = vmul.f32 %v1292_v51, %v1292_v51 }
 0x46a   :  { %v1315_v2 = vsub.f32 %v1311_v61, %v1313_v62 }
 0x46b   :  { %v1316_v3 = vsub.f32 %v1312_v0, %v1314_v7 }
 0x46c   :  { %v1317_v4 = vmax.f32 %v1315_v2, 0.0 }
 0x46d   :  { %v1318_v5 = vmax.f32 %v1316_v3, 0.0 }
 0x46e   :  { %v1321_v6 = vadd.f32 1e-05, %v1317_v4 }
 0x46f   :  { %v1322_v9 = vadd.f32 1e-05, %v1318_v5 }
 0x470   :  { %1768 = vrsqrt.f32 %v1321_v6 }
 0x471   :  { %1770 = vrsqrt.f32 %v1322_v9 }
 0x47a   :  { %v1769_v11 = vpop.eup %1768 }
 0x47b   :  { %v1771_v12 = vpop.eup %1770 }
 0x47c   :  { %v1327_v1 = vcombine.low %v1769_v11, %v1771_v12 }
 0x47e   :  { %v1334_v54 = vrot.slane %v1327_v1, %v1992_v48 }
 0x480   :  { %v1341_v53 = vrot.slane %v1334_v54, %v1992_v48 }
 0x482   :  { %v1343_v60 = vmul.f32 %v1557_v63, %v1341_v53 }
 0x484   :  { %v1350_v13 = vrot.slane %v1343_v60, %v1966_v8  ;;  %v1354_v58 = vrot.slane %v1343_v60, %v1972_v10 }
 0x486   :  { %v1357_v14 = vmul.f32 %v1350_v13, %v1291_v49  ;;  %v1358_v57 = vmul.f32 %v1354_v58, %v1292_v51  ;;  %v1378_v17 = vmul.f32 %v1350_v13, %v1268_v15  ;;  %v1379_v18 = vmul.f32 %v1354_v58, %v1270_v59 }
 0x487   :  { %v1380_v19 = vmul.f32 %v1350_v13, %v1272_v16  ;;  %v1381_v21 = vmul.f32 %v1354_v58, %v1274_v20 }
 0x488   :  { %v1361_v22 = vcombine.low %v1357_v14, %v1358_v57 }
 0x48a   :  { %v1368_v23 = vrot.slane %v1361_v22, %v1992_v48 }
 0x48c   :  { %v1375_v25 = vrot.slane %v1368_v23, %v1992_v48 }
 0x48e   :  { %v1377_v26 = vsub.f32 %v1558_v24, %v1375_v25 }
 0x490   :  { %v1386_v27 = vrot.slane %v1377_v26, %v1966_v8  ;;  %v1390_v28 = vrot.slane %v1377_v26, %v1972_v10 }
 0x492   :  { %v1393_v29 = vadd.f32 %v1386_v27, %v1378_v17  ;;  %v1394_v30 = vadd.f32 %v1390_v28, %v1379_v18  ;;  %v1395_v15 = vadd.f32 %v1386_v27, %v1380_v19  ;;  %v1396_v59 = vadd.f32 %v1390_v28, %v1381_v21 }
 0x494   :  { %v1397_v16 = vmax.f32 %v1393_v29, 0.0  ;;  %v1398_v20 = vmax.f32 %v1394_v30, 0.0  ;;  %v1399_v31 = vmax.f32 %v1395_v15, 0.0  ;;  %v1400_v32 = vmax.f32 %v1396_v59, 0.0 }
 0x496   :  { %v1402_v34 = vadd.f32 %v1772_v33, %v1398_v20  ;;  %v1404_v36 = vadd.f32 %v1773_v35, %v1400_v32  ;;  %v1401_v48 = vadd.f32 %v1397_v16, %v1957_v55  ;;  %v1403_v8 = vadd.f32 %v1399_v31, %v1959_v56 }
 0x498   :  { %1408 = vst [vmem:[#allocation8 + $0x18] sm:$0xff] %v1404_v36  ;;  %1406 = vst [vmem:[#allocation8 + $0x8] sm:$0xff] %v1402_v34 }
 0x499   :  { %1405 = vst [vmem:[#allocation8] sm:$0xff] %v1401_v48  ;;  %1407 = vst [vmem:[#allocation8 + $0x10] sm:$0xff] %v1403_v8 }
 0x49a   :  { %1851 = shalt.err (!%p1848_p0)
}
 0x49b   :  { %s1852_s27 = scalar_lea.hbm %s2068_s6, 512 }
 0x49c   :  { %p1853_p1 = scmp.ne.s32.totalorder %s2068_s6, %s1852_s27  ;;  %p1856_p2 = scmp.lt.u32.totalorder %s1852_s27, %s2068_s6 }
 0x49e   :  { %p1858_p3 = pnand %p1856_p2, %p1853_p1 }
 0x4a0   :  { %1861 = shalt.err (!%p1858_p3)
}
 0x4a1   :  { %1420 = dma.vmem_to_hbm [thread:$0]  %s1415_s24, 512, %s2068_s6, [#allocation4], %s1872_s1, %s1872_s1, %s1873_s21  }
 0x4a2   :  { %1866 = dma.done.wait [#allocation4], 512  }
 0x4a3   :  { %1867 = vsyncadd [#allocation4], 4294966784 }
 0x4a4   :  { %1424 = vsyncpa [#allocation3], 1 }
 0x4a5   :  { %1425 = vsyncpa [#allocation6], 1 }
 0x4a6   :  { %1426 = vsyncpa [#allocation4], 1 }

</bundles_post_ra>
